<compile_context>
chip_gen: v5e
topology: v5e:2x2
jax: 0.10.0
libtpu: 0.0.40
codegen_flags: <defaults>
</compile_context>

<pallas_src>
import functools

import jax
import jax.numpy as jnp
from jax.experimental import pallas as pl
from jax.experimental.pallas import tpu as pltpu


def _make_divisible(v, divisor, min_value=None):
    if min_value is None:
        min_value = divisor
    new_v = max(min_value, int(v + divisor / 2) // divisor * divisor)
    if new_v < 0.9 * v:
        new_v += divisor
    return new_v


def _se_kernel(x_ref, w1t_ref, b1_ref, w2t_ref, b2_ref, o_ref, *, inv_hw):
    # x_ref: (Bt, C, HWp)   w1t_ref: (C, hidden)   b1_ref: (1, hidden)
    # w2t_ref: (hidden, C)  b2_ref: (1, C)         o_ref: (Bt, C, HWp)
    x = x_ref[...]                                           # native dtype

    # squeeze: global average pool over spatial.  Pad lanes are zero, so sum
    # over the padded axis but divide by the TRUE HW.  Accumulate in f32 only
    # for the reduction (no full-tile f32 copy).
    y = jnp.sum(x, axis=-1, dtype=jnp.float32) * inv_hw      # (Bt, C)

    # excitation on the tiny (Bt, C) vector: fc1 -> ReLU -> fc2 -> h_sigmoid
    h = jnp.dot(y, w1t_ref[...], preferred_element_type=jnp.float32) + b1_ref[...]
    h = jnp.maximum(h, 0.0)                                  # (Bt, hidden)
    s = jnp.dot(h, w2t_ref[...], preferred_element_type=jnp.float32) + b2_ref[...]
    s = jnp.clip(s + 3.0, 0.0, 6.0) * (1.0 / 6.0)            # (Bt, C) h_sigmoid

    # scale in the native dtype: single fused multiply before the store.
    o_ref[...] = (x * s[:, :, None].astype(x.dtype)).astype(o_ref.dtype)


def _choose_batch_tile(B, C, hw_pad, itemsize, target_bytes=1 << 20):
    """Largest Bt dividing B with block ~target_bytes, but >=2 grid steps if B>=2."""
    per_batch = C * hw_pad * itemsize
    bt = max(1, target_bytes // per_batch)
    bt = min(bt, B)
    if B >= 2:
        bt = min(bt, B // 2)          # ensure >=2 parallel steps (v7x megacore)
    bt = max(1, bt)
    while B % bt != 0:                # must tile the batch axis exactly
        bt -= 1
    return bt


def se_layer(x_nchw, w1, b1, w2, b2):
    """x_nchw: (B, C, H, W).  w1: (hidden, C), b1: (hidden,), w2: (C, hidden), b2: (C,)."""
    B, C, H, W = x_nchw.shape
    hidden = w1.shape[0]
    HW = H * W
    HW_pad = ((HW + 127) // 128) * 128                       # lane-dense last dim

    x = x_nchw.reshape(B, C, HW)
    if HW_pad != HW:
        x = jnp.pad(x, ((0, 0), (0, 0), (0, HW_pad - HW)))   # zero pad (mean uses true HW)

    # pre-transpose weights so the kernel does plain (Bt, C) @ (C, hidden) matmuls
    w1t = w1.T                       # (C, hidden)
    w2t = w2.T                       # (hidden, C)
    b1_2d = b1.reshape(1, hidden)
    b2_2d = b2.reshape(1, C)

    itemsize = jnp.dtype(x.dtype).itemsize
    Bt = _choose_batch_tile(B, C, HW_pad, itemsize)
    grid = (B // Bt,)

    kernel = functools.partial(_se_kernel, inv_hw=1.0 / HW)

    # advisory cost: memory-bound read-reduce-scale-write
    bytes_accessed = 2 * B * C * HW_pad * itemsize + (w1.size + w2.size + b1.size + b2.size) * 4
    flops = 2 * B * C * HW + 2 * B * C * hidden * 2
    cost = pl.CostEstimate(flops=flops, transcendentals=0, bytes_accessed=bytes_accessed)

    out = pl.pallas_call(
        kernel,
        out_shape=jax.ShapeDtypeStruct((B, C, HW_pad), x.dtype),
        grid_spec=pltpu.PrefetchScalarGridSpec(
            num_scalar_prefetch=0,
            grid=grid,
            in_specs=[
                pl.BlockSpec((Bt, C, HW_pad), lambda b: (b, 0, 0)),
                pl.BlockSpec((C, hidden), lambda b: (0, 0)),
                pl.BlockSpec((1, hidden), lambda b: (0, 0)),
                pl.BlockSpec((hidden, C), lambda b: (0, 0)),
                pl.BlockSpec((1, C), lambda b: (0, 0)),
            ],
            out_specs=pl.BlockSpec((Bt, C, HW_pad), lambda b: (b, 0, 0)),
        ),
        compiler_params=pltpu.CompilerParams(
            dimension_semantics=("parallel",),
        ),
        cost_estimate=cost,
    )(x, w1t, b1_2d, w2t, b2_2d)

    if HW_pad != HW:
        out = out[:, :, :HW]
    return out.reshape(B, C, H, W)


def se_layer_ref(x, w1, b1, w2, b2):
    """Pure-JAX reference mirroring the PyTorch forward."""
    y = jnp.mean(x, axis=(2, 3))                              # (B, C)
    y = jnp.maximum(y @ w1.T + b1, 0.0)                       # (B, hidden)
    y = y @ w2.T + b2                                         # (B, C)
    y = jnp.clip(y + 3.0, 0.0, 6.0) / 6.0                     # h_sigmoid
    return x * y[:, :, None, None]


if __name__ == "__main__":
    # Small shapes consistent with the module.
    B, C, H, W = 2, 16, 8, 8
    reduction = 4
    hidden = _make_divisible(C // reduction, 8)               # -> 8

    key = jax.random.PRNGKey(0)
    kx, k1, kb1, k2, kb2 = jax.random.split(key, 5)

    x = jax.random.normal(kx, (B, C, H, W), dtype=jnp.float32)
    # deterministic synthetic parameters (nn.Linear shapes: (out, in) + (out,))
    w1 = jax.random.normal(k1, (hidden, C), dtype=jnp.float32) * 0.1
    b1 = jax.random.normal(kb1, (hidden,), dtype=jnp.float32) * 0.1
    w2 = jax.random.normal(k2, (C, hidden), dtype=jnp.float32) * 0.1
    b2 = jax.random.normal(kb2, (C,), dtype=jnp.float32) * 0.1

    out = se_layer(x, w1, b1, w2, b2)
    out = jax.block_until_ready(out)

    ref = se_layer_ref(x, w1, b1, w2, b2)
    assert out.shape == (B, C, H, W)
    assert jnp.allclose(out, ref, atol=1e-5, rtol=1e-5), "mismatch vs reference"

    print("KERNEL_OK")
</pallas_src>

<mosaic_0001>
module attributes {stable_mosaic.version = 11 : i64} {
  func.func @_se_kernel(%arg0: i32, %arg1: memref<1x16x128xf32, #tpu.memory_space<vmem>>, %arg2: memref<16x8xf32, #tpu.memory_space<vmem>>, %arg3: memref<1x8xf32, #tpu.memory_space<vmem>>, %arg4: memref<8x16xf32, #tpu.memory_space<vmem>>, %arg5: memref<1x16xf32, #tpu.memory_space<vmem>>, %arg6: memref<1x16x128xf32, #tpu.memory_space<vmem>>) attributes {dimension_semantics = [#tpu.dimension_semantics<parallel>], iteration_bounds = array<i64: 2>, scalar_prefetch = 0 : i64, scratch_operands = 0 : i64, tpu.core_type = #tpu.core_type<tc>, window_params = [{transform_indices = @transform_0, window_bounds = array<i64: 1, 16, 128>}, {pipeline_mode = #tpu.pipeline_mode<synchronous>, transform_indices = @transform_1, window_bounds = array<i64: 16, 8>}, {pipeline_mode = #tpu.pipeline_mode<synchronous>, transform_indices = @transform_2, window_bounds = array<i64: 1, 8>}, {pipeline_mode = #tpu.pipeline_mode<synchronous>, transform_indices = @transform_3, window_bounds = array<i64: 8, 16>}, {pipeline_mode = #tpu.pipeline_mode<synchronous>, transform_indices = @transform_4, window_bounds = array<i64: 1, 16>}, {transform_indices = @transform_5, window_bounds = array<i64: 1, 16, 128>}]} {
    %c0 = arith.constant 0 : index
    %c0_0 = arith.constant 0 : index
    %c0_1 = arith.constant 0 : index
    %0 = vector.load %arg1[%c0, %c0_0, %c0_1] : memref<1x16x128xf32, #tpu.memory_space<vmem>>, vector<1x16x128xf32>
    %cst = arith.constant dense<0.000000e+00> : vector<1x16xf32>
    %1 = vector.multi_reduction <add>, %0, %cst [2] : vector<1x16x128xf32> to vector<1x16xf32>
    %cst_2 = arith.constant 1.562500e-02 : f32
    %2 = vector.broadcast %cst_2 : f32 to vector<1x16xf32>
    %3 = arith.mulf %1, %2 : vector<1x16xf32>
    %c0_3 = arith.constant 0 : index
    %c0_4 = arith.constant 0 : index
    %4 = vector.load %arg2[%c0_3, %c0_4] : memref<16x8xf32, #tpu.memory_space<vmem>>, vector<16x8xf32>
    %cst_5 = arith.constant dense<0.000000e+00> : vector<1x8xf32>
    %5 = tpu.matmul %3, %4, %cst_5 {dimension_numbers = #tpu.dot_dimension_numbers<[1], [0], [0], [1], [0, 0, 1, 1], [], []>} : vector<1x16xf32>, vector<16x8xf32>, vector<1x8xf32> -> vector<1x8xf32>
    %c0_6 = arith.constant 0 : index
    %c0_7 = arith.constant 0 : index
    %6 = vector.load %arg3[%c0_6, %c0_7] : memref<1x8xf32, #tpu.memory_space<vmem>>, vector<1x8xf32>
    %7 = arith.addf %5, %6 : vector<1x8xf32>
    %cst_8 = arith.constant 0.000000e+00 : f32
    %8 = vector.broadcast %cst_8 : f32 to vector<1x8xf32>
    %9 = arith.maximumf %7, %8 : vector<1x8xf32>
    %c0_9 = arith.constant 0 : index
    %c0_10 = arith.constant 0 : index
    %10 = vector.load %arg4[%c0_9, %c0_10] : memref<8x16xf32, #tpu.memory_space<vmem>>, vector<8x16xf32>
    %cst_11 = arith.constant dense<0.000000e+00> : vector<1x16xf32>
    %11 = tpu.matmul %9, %10, %cst_11 {dimension_numbers = #tpu.dot_dimension_numbers<[1], [0], [0], [1], [0, 0, 1, 1], [], []>} : vector<1x8xf32>, vector<8x16xf32>, vector<1x16xf32> -> vector<1x16xf32>
    %c0_12 = arith.constant 0 : index
    %c0_13 = arith.constant 0 : index
    %12 = vector.load %arg5[%c0_12, %c0_13] : memref<1x16xf32, #tpu.memory_space<vmem>>, vector<1x16xf32>
    %13 = arith.addf %11, %12 : vector<1x16xf32>
    %cst_14 = arith.constant 3.000000e+00 : f32
    %14 = vector.broadcast %cst_14 : f32 to vector<1x16xf32>
    %15 = arith.addf %13, %14 : vector<1x16xf32>
    %cst_15 = arith.constant 0.000000e+00 : f32
    %cst_16 = arith.constant 6.000000e+00 : f32
    %16 = vector.broadcast %cst_15 : f32 to vector<1x16xf32>
    %17 = arith.maximumf %16, %15 : vector<1x16xf32>
    %18 = vector.broadcast %cst_16 : f32 to vector<1x16xf32>
    %19 = arith.minimumf %18, %17 : vector<1x16xf32>
    %cst_17 = arith.constant 0.166666672 : f32
    %20 = vector.broadcast %cst_17 : f32 to vector<1x16xf32>
    %21 = arith.mulf %19, %20 : vector<1x16xf32>
    %22 = vector.shape_cast %21 : vector<1x16xf32> to vector<1x16x1xf32>
    %23 = vector.broadcast %22 : vector<1x16x1xf32> to vector<1x16x128xf32>
    %24 = arith.mulf %0, %23 : vector<1x16x128xf32>
    %c0_18 = arith.constant 0 : index
    %c0_19 = arith.constant 0 : index
    %c0_20 = arith.constant 0 : index
    %25 = vector.load %arg6[%c0_18, %c0_19, %c0_20] : memref<1x16x128xf32, #tpu.memory_space<vmem>>, vector<1x16x128xf32>
    tpu.vector_store %arg6[%c0_18, %c0_19, %c0_20], %24 {strides = array<i32>} : memref<1x16x128xf32, #tpu.memory_space<vmem>>, vector<1x16x128xf32>,
    return
  }
  func.func @transform_0(%arg0: i32) -> (i32, i32, i32) {
    %c0_i32 = arith.constant 0 : i32
    %c0_i32_0 = arith.constant 0 : i32
    %c0_i32_1 = arith.constant 0 : i32
    return %arg0, %c0_i32, %c0_i32_0 : i32, i32, i32
  }
  func.func @transform_1(%arg0: i32) -> (i32, i32) {
    %c0_i32 = arith.constant 0 : i32
    %c0_i32_0 = arith.constant 0 : i32
    %c0_i32_1 = arith.constant 0 : i32
    return %c0_i32, %c0_i32_0 : i32, i32
  }
  func.func @transform_2(%arg0: i32) -> (i32, i32) {
    %c0_i32 = arith.constant 0 : i32
    %c0_i32_0 = arith.constant 0 : i32
    %c0_i32_1 = arith.constant 0 : i32
    return %c0_i32, %c0_i32_0 : i32, i32
  }
  func.func @transform_3(%arg0: i32) -> (i32, i32) {
    %c0_i32 = arith.constant 0 : i32
    %c0_i32_0 = arith.constant 0 : i32
    %c0_i32_1 = arith.constant 0 : i32
    return %c0_i32, %c0_i32_0 : i32, i32
  }
  func.func @transform_4(%arg0: i32) -> (i32, i32) {
    %c0_i32 = arith.constant 0 : i32
    %c0_i32_0 = arith.constant 0 : i32
    %c0_i32_1 = arith.constant 0 : i32
    return %c0_i32, %c0_i32_0 : i32, i32
  }
  func.func @transform_5(%arg0: i32) -> (i32, i32, i32) {
    %c0_i32 = arith.constant 0 : i32
    %c0_i32_0 = arith.constant 0 : i32
    %c0_i32_1 = arith.constant 0 : i32
    return %arg0, %c0_i32, %c0_i32_0 : i32, i32, i32
  }
}

</mosaic_0001>

<bundles_post_ra>
// kernel: tpu_custom_call.1
= control target key start
LH: loop header
LB: loop body
LE: loop exit
PB: predicated region body
PF: predicated region fallthrough
CT: control target
= control target key end

     0   :  { %10 = vsyncpa [#allocation3], 0  ;;  %s774_s0 = inlined_call_operand.hbm [shape: f32[2,16,128], index: 0, kind: input, shape index: {}]   ;;  %s775_s1 = inlined_call_operand.vmem [shape: f32[16,8], index: 1, kind: input, shape index: {}]   ;;  %s776_s2 = inlined_call_operand.vmem [shape: f32[1,8], index: 2, kind: input, shape index: {}]   ;;  %s777_s3 = inlined_call_operand.vmem [shape: f32[8,16], index: 3, kind: input, shape index: {}]   ;;  %s778_s4 = inlined_call_operand.vmem [shape: f32[1,16], index: 4, kind: input, shape index: {}]   ;;  %s779_s5 = inlined_call_operand.hbm [shape: f32[2,16,128], index: 5, kind: output, shape index: {}]  }
   0x1   :  { %12 = vsyncpa [#allocation3 + $0x1], 0 }
   0x2   :  { %13 = vsyncpa [#allocation4], 0 }
   0x3   :  { %15 = vsyncpa [#allocation4 + $0x1], 0  ;;  %s628_s18 = smov 0   ;;  %s630_s19 = smov 0  }
   0x4   :  { %s632_s20 = smov 0   ;;  %s634_s21 = smov 0  }
   0x5 LB: > { %s649_s22 = sadd.s32 4294967295, %s592_s21   ;;  %s425_s23 = sadd.s32 4294967294, %s592_s21   ;;  %s592_s21 = sphi %s634_s21, %s789_s21   ;;  %s588_s20 = sphi %s632_s20, %s788_s20   ;;  %s584_s19 = sphi %s630_s19, %s787_s19   ;;  %s580_s18 = sphi %s628_s18, %s786_s18  }
   0x6   : > { %s653_s24 = sadd.s32 1, %s592_s21   ;;  %s28_s25 = sadd.s32 1, %s588_s20 }
   0x7   : > { %s25_s26 = ssub.s32 %s592_s21, %s653_s24  ;;  %p35_p0 = scmp.ne.s32.totalorder %s588_s20, %s584_s19 }
   0x8   : > { %p26_p1 = scmp.eq.s32.totalorder %s25_s26, 0  ;;  %p36_p2 = scmp.eq.s32.totalorder %s592_s21, 0 }
   0x9   : > { %p41_p3 = scmp.ne.s32.totalorder %s584_s19, %s580_s18  ;;  %p42_p4 = scmp.eq.s32.totalorder %s649_s22, 0 }
   0xa   : > { %s665_s27 = scalar_select %p26_p1, %s588_s20, %s28_s25  }
   0xb   : > { %p667_p5 = por %p36_p2, %p35_p0  ;;  %p671_p6 = por %p42_p4, %p41_p3 }
   0xc   : > { %p149_p7 = scmp.eq.s32.totalorder %s649_s22, 1  ;;  %p155_p8 = scmp.eq.s32.totalorder %s425_s23, 1 }
   0xd   : > { %p455_p10 = scmp.lt.s32.totalorder %s592_s21, 2  ;;  %s187_s7 = sand.u32 1, %s588_s20  }
   0xe   : > { %p678_p11 = por %p149_p7, %p35_p0  ;;  %p682_p12 = por %p155_p8, %p41_p3 }
   0xf   : > { %s441_s8 = sshll.u32 %s592_s21, 4  ;;  %s428_s9 = sshll.u32 %s187_s7, 4 }
  0x10   : > { %s196_s12 = scalar_lea.hbm %s774_s0, %s441_s8  ;;  %s191_s14 = scalar_lea.vmem [#allocation2], %s428_s9 }
  0x11   : > { %s197_s13 = sshll.u32 %s196_s12, 4  ;;  %s199_s15 = sshll.u32 %s191_s14, 4  ;;  %s198_s13 = int_to_ptr.hbm [resolvable:$true] %s197_s13  ;;  %s200_s15 = int_to_ptr.vmem [resolvable:$true] %s199_s15 }
  0x12   : > { %p693_p13 = pnand %p455_p10, %p667_p5  ;;  %p431_p0 = scmp.ge.s32.totalorder %s592_s21, 1 }
  0x13   : > { %p207_p1 = scmp.lt.s32.totalorder %s592_s21, 3  ;;  %s188_s17 = scalar_lea.sflag [#allocation3], %s187_s7 }
  0x14   : > { %s496_s23 = sshra.s32 %s198_s13, 4  ;;  %p500_p3 = pneg %p693_p13  ;;  %s497_s23 = int_to_ptr.hbm [resolvable:$true] %s496_s23 }
  0x15   : > { %s498_s25 = scalar_lea.hbm %s497_s23, 16  ;;  %s503_s28 = scalar_lea.hbm %s774_s0, 32 }
  0x16   : > { %p499_p2 = scmp.ne.s32.totalorder %s497_s23, %s498_s25  ;;  %p504_p5 = scmp.lt.s32.totalorder %s497_s23, %s774_s0 }
  0x17   : > { %p505_p8 = scmp.lt.s32.totalorder %s503_s28, %s498_s25 }
  0x18   : > { %p501_p4 = pnand %p500_p3, %p499_p2 }
  0x19   : > { %p506_p10 = por %p505_p8, %p504_p5 }
  0x1a   : > { %p502_p7 = pneg %p501_p4 }
  0x1c   : > { %p507_p9 = pnand %p506_p10, %p502_p7 }
  0x1e   : > { %510 = shalt.err (!%p507_p9)
}
  0x1f   : > { %s594_s7 = smov 128   ;;  %s595_s11 = smov 8  }
  0x20   : > { %450 = dma.hbm_to_vmem [thread:$0]  (!%p693_p13), %s198_s13, 256, %s200_s15, %s188_s17, %s594_s7, %s594_s7, %s595_s11  }
  0x21   : > { %p208_p2 = pnand %p431_p0, %p207_p1 }
  0x22   : > { %s714_s12 = sand.u32 (!%p208_p2), 1, %s584_s19  }
  0x23   : > { %211 = sbr.rel (%p208_p2) target bundleno = 576 (0x240), region = 40  ;;  %s432_s14 = sshll.u32 (!%p208_p2), %s714_s12, 4 }
  0x24   : > { %s214_s23 = scalar_lea.sflag (!%p208_p2), [#allocation3], %s714_s12  ;;  %s217_s25 = scalar_lea.vmem (!%p208_p2), [#allocation2], %s432_s14 }
  0x28   : > { %571 = dma.done.wait (%p671_p6), %s214_s23, 256  }
  0x29   : > { %573 = vsyncadd (%p671_p6), %s214_s23, 4294967040  ;;  %v245_v0 = vld [vmem:[%s217_s25] sm:$0xff]  ;;  %v246_v1 = vld [vmem:[%s217_s25 + $0x8] sm:$0xff]  ;;  %v258_v5 = vlaneseq  ;;  %vm263_vm0 = vcmask 130112   ;;  %vm265_vm1 = vcmask 130048   ;;  %vm291_vm2 = vcmask 64512  }
  0x2a   : > { %247 = vadd.xlane.f32.xlu0 %v245_v0  ;;  %v254_v2 = vld [vmem:[%s775_s1 + $0x8] sm:$0xff]  ;;  %v253_v3 = vld [vmem:[%s775_s1] sm:$0xff]  ;;  %s244_s7 = scalar_lea.vmem [#allocation5], %s432_s14  ;;  %s442_s11 = sshll.u32 %s649_s22, 4 }
  0x2b   : > { %282 = vmatpush.msra.mxu0 %v254_v2  ;;  %v259_v6 = vand.u32 127, %v258_v5  ;;  %v289_v14 = vld [vmem:[%s777_s3] sm:$0xff]  ;;  %v321_v19 = vshrl.u32 %v258_v5, 7  ;;  %s348_s13 = scalar_lea.hbm %s779_s5, %s442_s11  ;;  %s349_s15 = sshll.u32 %s244_s7, 4  ;;  %s350_s15 = int_to_ptr.vmem [resolvable:$true] %s349_s15 }
  0x2c   : > { %310 = vmatpush.msra.mxu1 %v289_v14  ;;  %v255_v15 = vld [vmem:[%s776_s2] sm:$0x1]  ;;  %s351_s16 = sshll.u32 %s348_s13, 4  ;;  %s337_s17 = scalar_lea.sflag [#allocation4], %s714_s12  ;;  %s352_s16 = int_to_ptr.hbm [resolvable:$true] %s351_s16 }
  0x2d   : > { %283 = vmatpush.msra.mxu0 %v253_v3  ;;  %v261_v8 = vadd.s32 4294967288, %v259_v6  ;;  %493 = vset.pattern.permute.xlu1 %v321_v19  ;;  %v328_v20 = vadd.s32 8, %v321_v19  ;;  %v290_v21 = vld [vmem:[%s778_s4] sm:$0x1]  ;;  %s540_s29 = sshra.s32 %s352_s16, 4  ;;  %s546_s8 = scalar_lea.hbm %s779_s5, 32  ;;  %s541_s29 = int_to_ptr.hbm [resolvable:$true] %s540_s29 }
  0x2e   : > { %s542_s26 = scalar_lea.hbm %s541_s29, 16  ;;  %p547_p0 = scmp.lt.s32.totalorder %s541_s29, %s779_s5 }
  0x2f   : > { %495 = vset.pattern.permute.xlu0 %v328_v20  ;;  %p543_p6 = scmp.ne.s32.totalorder %s541_s29, %s542_s26  ;;  %p548_p1 = scmp.lt.s32.totalorder %s546_s8, %s542_s26 }
  0x31   : > { %p544_p9 = pnand %p543_p6, %p678_p11  ;;  %p549_p3 = por %p548_p1, %p547_p0 }
  0x32   : > { %249 = vadd.xlane.f32.xlu0 %v246_v1 }
  0x33   : > { %p545_p13 = pneg %p544_p9 }
  0x35   : > { %p550_p4 = pnand %p549_p3, %p545_p13 }
  0x9d   : > { %v248_v4 = vpop.xlane.xlu0 %247 }
  0x9e   : > { %v251_v7 = vmul.f32 0.015625, %v248_v4 }
  0xa0   : > { %v260_v11 = vperm.slane %v251_v7, %v259_v6 }
  0xa5   : > { %v250_v9 = vpop.xlane.xlu0 %249 }
  0xa6   : > { %v252_v10 = vmul.f32 0.015625, %v250_v9 }
  0xa8   : > { %v262_v12 = vperm.slane %v252_v10, %v261_v8 }
  0xaa   : > { %v264_v13 = vsel %vm263_vm0, %v262_v12, %v260_v11 }
  0xab   : > { %434 = vmatmul.msk.f32.vlgmr.msra.gmra.mxu0 %vm265_vm1, %v264_v13 }
 0x128   : > { %v285_v16 = vpop.f32.mrf.mxu0 }
 0x129   : > { %v286_v17 = vadd.f32 %v285_v16, %v255_v15 }
 0x12b   : > { %v288_v18 = vmax.f32 %v286_v17, 0.0 }
 0x12d   : > { %435 = vmatmul.msk.f32.vlgmr.msra.gmra.mxu1 %vm291_vm2, %v288_v18 }
 0x1aa   : > { %v312_v22 = vpop.f32.mrf.mxu1 }
 0x1ab   : > { %v313_v23 = vadd.f32 %v312_v22, %v290_v21 }
 0x1ad   : > { %v315_v24 = vadd.f32 3.0, %v313_v23 }
 0x1af   : > { %v316_v25 = vmax.f32 %v315_v24, 0.0 }
 0x1b1   : > { %v317_v26 = vmin.f32 %v316_v25, 6.0 }
 0x1b3   : > { %v318_v27 = vmul.f32 0.16666667, %v317_v26 }
 0x1b5   : > { %v319_v28 = vperm.slane %v318_v27, 0 }
 0x1b7   : > { %324 = vperm.xlu1 %493, %v319_v28  }
 0x1bf   : > { %494 = vset.pattern.permute.xlu1 %v328_v20 }
 0x1c7   : > { %330 = vperm.xlu1 %494, %v319_v28  }
 0x229   : > { %v325_v29 = vpop.permute.xlu1 %324 }
 0x22a   : > { %v332_v30 = vmul.f32 %v325_v29, %v245_v0 }
 0x22c   : > { %334 = vst [vmem:[%s244_s7] sm:$0xff] %v332_v30 }
 0x239   : > { %v331_v31 = vpop.permute.xlu1 %330 }
 0x23a   : > { %v333_v32 = vmul.f32 %v331_v31, %v246_v1 }
 0x23c   : > { %335 = vst [vmem:[%s244_s7 + $0x8] sm:$0xff] %v333_v32 }
 0x23d   : > { %553 = shalt.err (!%p550_p4)
}
 0x23e   : > { %s596_s12 = smov 128   ;;  %s597_s10 = smov 8  }
 0x23f   : > { %445 = dma.vmem_to_hbm [thread:$0]  (%p678_p11), %s350_s15, 256, %s352_s16, %s337_s17, %s596_s12, %s596_s12, %s597_s10  }
 0x240 PF: > { %s366_s7 = sand.u32 1, %s580_s18   ;;  %p785_p7 = scmp.ge.s32.totalorder %s592_s21, 2 }
 0x241   : > { %s367_s11 = scalar_lea.sflag [#allocation4], %s366_s7 }
 0x242   : > { %p452_p5 = pnand %p785_p7, %p682_p12 }
 0x244   : > { %p453_p8 = pneg %p452_p5 }
 0x246   : > { %575 = dma.done.wait (%p453_p8), %s367_s11, 256  }
 0x247   : > { %577 = vsyncadd (%p453_p8), %s367_s11, 4294967040  ;;  %p18_p10 = scmp.ge.s32.totalorder %s653_s24, 4   ;;  %s786_s18 = smov %s584_s19 }
 0x248   : > { %s787_s19 = smov %s588_s20  ;;  %s788_s20 = smov %s665_s27 }
 0x249   : > { %s789_s21 = smov %s653_s24  ;;  %20 = sbr.rel (!%p18_p10) target bundleno = 5 (0x5), region = 85 }
 0x24e   :  { %373 = vsyncpa [#allocation3], 1 }
 0x24f   :  { %375 = vsyncpa [#allocation3 + $0x1], 1 }
 0x250   :  { %376 = vsyncpa [#allocation4], 1 }
 0x251   :  { %378 = vsyncpa [#allocation4 + $0x1], 1 }

</bundles_post_ra>
